<compile_context>
chip_gen: v7x
topology: tpu7x:2x2x1
jax: 0.10.0
libtpu: 0.0.40
codegen_flags: <defaults>
</compile_context>

<pallas_src>
import functools

import jax
import jax.numpy as jnp
from jax import lax
from jax.experimental import pallas as pl
from jax.experimental.pallas import tpu as pltpu

EPS = 1e-5          # nn.BatchNorm2d default eps
NEG_SLOPE = 0.2     # nn.LeakyReLU(0.2)

MAX_BLK = 16384     # lanes per grid step; (16+8)*16384*4B ~= 1.5 MiB/step, far under VMEM
CHUNK = 512         # in-kernel lane sub-chunk; bounds vreg pressure (~35 live vregs)


def _round_up(a, m):
    return (a + m - 1) // m * m


def _cdiv(a, b):
    return (a + b - 1) // b


def _basic_block_au_kernel(x_ref, w_ref, scale_ref, shift_ref, o_ref, *,
                           c_in, c_out, blk, chunk, slope):
    """One lane-block per grid step.

    x_ref:     (c_in*4, blk)  VMEM - row ci*4 + t holds 2x2-pool tap t of input channel ci
    w_ref:     (c_out, c_in)  VMEM - 1x1 conv weight
    scale_ref: (c_out, 1)     VMEM - gamma * rsqrt(running_var + eps)
    shift_ref: (c_out, 1)     VMEM - (conv_bias - running_mean) * scale + beta
    o_ref:     (c_out, blk)   VMEM - lane-dense output block
    """
    # Tiny per-channel constants, hoisted once per grid step (JAX does not CSE broadcasts).
    w = w_ref[...].astype(jnp.float32)                          # (c_out, c_in)
    w_cols = [w[:, ci:ci + 1] for ci in range(c_in)]            # (c_out, 1) each
    scale_b = jnp.broadcast_to(scale_ref[...].astype(jnp.float32), (c_out, chunk))
    shift_b = jnp.broadcast_to(shift_ref[...].astype(jnp.float32), (c_out, chunk))

    # Static unroll over lane sub-chunks; each chunk's store retires its vregs early.
    for lo in range(0, blk, chunk):
        xc = x_ref[:, lo:lo + chunk].astype(jnp.float32)        # (c_in*4, chunk) dense load
        m = None
        for t in range(4):                                      # 2x2 max-pool window taps
            y = None
            for ci in range(c_in):
                row = xc[ci * 4 + t: ci * 4 + t + 1, :]         # (1, chunk)
                term = w_cols[ci] * row                         # -> (c_out, chunk), VPU FMA
                y = term if y is None else y + term
            m = y if m is None else jnp.maximum(m, y)           # fused MaxPool2d(2,2)
        z = m * scale_b + shift_b                               # conv bias + eval BN (folded)
        o_ref[:, lo:lo + chunk] = jnp.maximum(z, slope * z).astype(o_ref.dtype)  # LeakyReLU
    # TODO(synk): if channel counts grow (>=~16-32), switch the channel mix to the MXU
    #             (per-tap jnp.dot of (c_out,c_in)x(c_in,chunk) + a 3-op maximum tree).


def basic_block_au(x_nchw, params):
    """x_nchw: (N, C_in, H, W).

    params = (w, b, gamma, beta, running_mean, running_var)
      w: (C_out, C_in, 1, 1) conv weight (PyTorch layout), b: (C_out,) conv bias.

    BatchNorm2d is applied in inference (eval) mode with running statistics.
    """
    w, b, gamma, beta, rmean, rvar = params
    N, c_in, H, W = x_nchw.shape
    c_out = w.shape[0]
    assert w.shape[2:] == (1, 1), "kernel implements the module's default 1x1 conv"
    # TODO(synk): general kernel_size/stride/padding would need an im2col path; the module
    #             defaults (1x1, stride 1, pad 0) are implemented.
    # TODO(synk): training-mode BatchNorm (batch statistics) would need a cross-block
    #             reduction; eval-mode running statistics are used (inference semantics).
    Ho, Wo = H // 2, W // 2                       # MaxPool2d(2,2), floor mode
    P = N * Ho * Wo

    # ---- wrapper-side layout plumbing --------------------------------------------------
    # TODO(synk): in a full model, keep the (C, N*Ho*Wo) channel-major layout between
    #             adjacent layers to avoid these HBM<->HBM transpose ops round-tripping NCHW.
    x = x_nchw[:, :, :Ho * 2, :Wo * 2]
    x = x.reshape(N, c_in, Ho, 2, Wo, 2)
    x = jnp.transpose(x, (1, 3, 5, 0, 2, 4))      # (c_in, 2, 2, N, Ho, Wo)
    x = x.reshape(c_in * 4, P)                    # row = ci*4 + (kh*2 + kw); dtype preserved

    # Block sizing: large lane blocks amortize per-step overhead; keep >=2 steps when the
    # problem is big enough so v7x's two TensorCores both get work.
    P128 = _round_up(P, 128)
    n_steps = _cdiv(P128, MAX_BLK)
    if n_steps < 2 and P128 >= 2 * CHUNK:
        n_steps = 2
    if P128 >= CHUNK:
        blk = _round_up(_cdiv(P128, n_steps), CHUNK)
    else:
        blk = P128
    chunk = CHUNK if blk % CHUNK == 0 else 128
    P_pad = _round_up(P, blk)
    if P_pad != P:
        x = jnp.pad(x, ((0, 0), (0, P_pad - P)))
    grid = (P_pad // blk,)

    # Fold conv bias + eval-mode BatchNorm into a single per-channel affine (post-pool).
    scale = (gamma * lax.rsqrt(rvar + EPS)).astype(jnp.float32)
    shift = ((b - rmean) * scale + beta).astype(jnp.float32)
    w2 = w.reshape(c_out, c_in).astype(jnp.float32)
    scale = scale.reshape(c_out, 1)
    shift = shift.reshape(c_out, 1)

    kernel = functools.partial(_basic_block_au_kernel, c_in=c_in, c_out=c_out,
                               blk=blk, chunk=chunk, slope=NEG_SLOPE)
    out = pl.pallas_call(
        kernel,
        out_shape=jax.ShapeDtypeStruct((c_out, P_pad), x_nchw.dtype),
        grid_spec=pltpu.PrefetchScalarGridSpec(
            num_scalar_prefetch=0,
            grid=grid,
            in_specs=[
                pl.BlockSpec((c_in * 4, blk), lambda i: (0, i)),   # activations (dense tiles)
                pl.BlockSpec((c_out, c_in), lambda i: (0, 0)),     # conv weight
                pl.BlockSpec((c_out, 1), lambda i: (0, 0)),        # fused BN scale
                pl.BlockSpec((c_out, 1), lambda i: (0, 0)),        # fused BN shift (+bias)
            ],
            out_specs=pl.BlockSpec((c_out, blk), lambda i: (0, i)),
        ),
        compiler_params=pltpu.CompilerParams(
            dimension_semantics=("parallel",),
        ),
    )(x, w2, scale, shift)

    out = out[:, :P].reshape(c_out, N, Ho, Wo)
    return jnp.transpose(out, (1, 0, 2, 3))       # back to NCHW


def basic_block_au_reference(x, params):
    """Pure-JAX reference mirroring the PyTorch forward (eval-mode BatchNorm)."""
    w, b, gamma, beta, rmean, rvar = params
    y = lax.conv_general_dilated(
        x, w, window_strides=(1, 1), padding="VALID",
        dimension_numbers=("NCHW", "OIHW", "NCHW"))
    y = y + b.reshape(1, -1, 1, 1)
    y = lax.reduce_window(y, -jnp.inf, lax.max,
                          window_dimensions=(1, 1, 2, 2),
                          window_strides=(1, 1, 2, 2), padding="VALID")
    scale = (gamma * lax.rsqrt(rvar + EPS)).reshape(1, -1, 1, 1)
    y = (y - rmean.reshape(1, -1, 1, 1)) * scale + beta.reshape(1, -1, 1, 1)
    return jnp.where(y >= 0, y, NEG_SLOPE * y)


if __name__ == "__main__":
    N, C_IN, C_OUT, H, W = 2, 4, 8, 16, 16
    key = jax.random.PRNGKey(0)
    ks = jax.random.split(key, 7)
    x = jax.random.normal(ks[0], (N, C_IN, H, W), jnp.float32)
    w = jax.random.normal(ks[1], (C_OUT, C_IN, 1, 1), jnp.float32) * 0.5
    b = 0.1 * jax.random.normal(ks[2], (C_OUT,), jnp.float32)
    gamma = 1.0 + 0.1 * jax.random.normal(ks[3], (C_OUT,), jnp.float32)
    beta = 0.1 * jax.random.normal(ks[4], (C_OUT,), jnp.float32)
    rmean = 0.1 * jax.random.normal(ks[5], (C_OUT,), jnp.float32)
    rvar = 0.5 + jax.random.uniform(ks[6], (C_OUT,), jnp.float32)
    params = (w, b, gamma, beta, rmean, rvar)

    out = jax.block_until_ready(basic_block_au(x, params))
    ref = basic_block_au_reference(x, params)
    assert out.shape == (N, C_OUT, H // 2, W // 2) and out.dtype == x.dtype
    assert jnp.allclose(out, ref, atol=1e-4, rtol=1e-4), float(jnp.max(jnp.abs(out - ref)))
    print("KERNEL_OK")
</pallas_src>

<mosaic_0001>
module attributes {stable_mosaic.version = 11 : i64} {
  func.func @_basic_block_au_kernel(%arg0: i32, %arg1: memref<16x128xf32, #tpu.memory_space<vmem>>, %arg2: memref<8x4xf32, #tpu.memory_space<vmem>>, %arg3: memref<8x1xf32, #tpu.memory_space<vmem>>, %arg4: memref<8x1xf32, #tpu.memory_space<vmem>>, %arg5: memref<8x128xf32, #tpu.memory_space<vmem>>) attributes {dimension_semantics = [#tpu.dimension_semantics<parallel>], iteration_bounds = array<i64: 1>, scalar_prefetch = 0 : i64, scratch_operands = 0 : i64, tpu.core_type = #tpu.core_type<tc>, window_params = [{transform_indices = @transform_0, window_bounds = array<i64: 16, 128>}, {pipeline_mode = #tpu.pipeline_mode<synchronous>, transform_indices = @transform_1, window_bounds = array<i64: 8, 4>}, {pipeline_mode = #tpu.pipeline_mode<synchronous>, transform_indices = @transform_2, window_bounds = array<i64: 8, 1>}, {pipeline_mode = #tpu.pipeline_mode<synchronous>, transform_indices = @transform_3, window_bounds = array<i64: 8, 1>}, {transform_indices = @transform_4, window_bounds = array<i64: 8, 128>}]} {
    %c0 = arith.constant 0 : index
    %c0_0 = arith.constant 0 : index
    %0 = vector.load %arg2[%c0, %c0_0] : memref<8x4xf32, #tpu.memory_space<vmem>>, vector<8x4xf32>
    %1 = vector.extract_strided_slice %0 {offsets = [0, 0], sizes = [8, 1], strides = [1, 1]} : vector<8x4xf32> to vector<8x1xf32>
    %2 = vector.extract_strided_slice %0 {offsets = [0, 1], sizes = [8, 1], strides = [1, 1]} : vector<8x4xf32> to vector<8x1xf32>
    %3 = vector.extract_strided_slice %0 {offsets = [0, 2], sizes = [8, 1], strides = [1, 1]} : vector<8x4xf32> to vector<8x1xf32>
    %4 = vector.extract_strided_slice %0 {offsets = [0, 3], sizes = [8, 1], strides = [1, 1]} : vector<8x4xf32> to vector<8x1xf32>
    %c0_1 = arith.constant 0 : index
    %c0_2 = arith.constant 0 : index
    %5 = vector.load %arg3[%c0_1, %c0_2] : memref<8x1xf32, #tpu.memory_space<vmem>>, vector<8x1xf32>
    %6 = vector.shape_cast %5 : vector<8x1xf32> to vector<8x1xf32>
    %7 = vector.broadcast %6 : vector<8x1xf32> to vector<8x128xf32>
    %c0_3 = arith.constant 0 : index
    %c0_4 = arith.constant 0 : index
    %8 = vector.load %arg4[%c0_3, %c0_4] : memref<8x1xf32, #tpu.memory_space<vmem>>, vector<8x1xf32>
    %9 = vector.shape_cast %8 : vector<8x1xf32> to vector<8x1xf32>
    %10 = vector.broadcast %9 : vector<8x1xf32> to vector<8x128xf32>
    %c0_5 = arith.constant 0 : index
    %c0_6 = arith.constant 0 : index
    %11 = vector.load %arg1[%c0_5, %c0_6] : memref<16x128xf32, #tpu.memory_space<vmem>>, vector<16x128xf32>
    %12 = vector.extract_strided_slice %11 {offsets = [0, 0], sizes = [1, 128], strides = [1, 1]} : vector<16x128xf32> to vector<1x128xf32>
    %13 = vector.broadcast %1 : vector<8x1xf32> to vector<8x128xf32>
    %14 = vector.broadcast %12 : vector<1x128xf32> to vector<8x128xf32>
    %15 = arith.mulf %13, %14 : vector<8x128xf32>
    %16 = vector.extract_strided_slice %11 {offsets = [4, 0], sizes = [1, 128], strides = [1, 1]} : vector<16x128xf32> to vector<1x128xf32>
    %17 = vector.broadcast %2 : vector<8x1xf32> to vector<8x128xf32>
    %18 = vector.broadcast %16 : vector<1x128xf32> to vector<8x128xf32>
    %19 = arith.mulf %17, %18 : vector<8x128xf32>
    %20 = arith.addf %15, %19 : vector<8x128xf32>
    %21 = vector.extract_strided_slice %11 {offsets = [8, 0], sizes = [1, 128], strides = [1, 1]} : vector<16x128xf32> to vector<1x128xf32>
    %22 = vector.broadcast %3 : vector<8x1xf32> to vector<8x128xf32>
    %23 = vector.broadcast %21 : vector<1x128xf32> to vector<8x128xf32>
    %24 = arith.mulf %22, %23 : vector<8x128xf32>
    %25 = arith.addf %20, %24 : vector<8x128xf32>
    %26 = vector.extract_strided_slice %11 {offsets = [12, 0], sizes = [1, 128], strides = [1, 1]} : vector<16x128xf32> to vector<1x128xf32>
    %27 = vector.broadcast %4 : vector<8x1xf32> to vector<8x128xf32>
    %28 = vector.broadcast %26 : vector<1x128xf32> to vector<8x128xf32>
    %29 = arith.mulf %27, %28 : vector<8x128xf32>
    %30 = arith.addf %25, %29 : vector<8x128xf32>
    %31 = vector.extract_strided_slice %11 {offsets = [1, 0], sizes = [1, 128], strides = [1, 1]} : vector<16x128xf32> to vector<1x128xf32>
    %32 = vector.broadcast %1 : vector<8x1xf32> to vector<8x128xf32>
    %33 = vector.broadcast %31 : vector<1x128xf32> to vector<8x128xf32>
    %34 = arith.mulf %32, %33 : vector<8x128xf32>
    %35 = vector.extract_strided_slice %11 {offsets = [5, 0], sizes = [1, 128], strides = [1, 1]} : vector<16x128xf32> to vector<1x128xf32>
    %36 = vector.broadcast %2 : vector<8x1xf32> to vector<8x128xf32>
    %37 = vector.broadcast %35 : vector<1x128xf32> to vector<8x128xf32>
    %38 = arith.mulf %36, %37 : vector<8x128xf32>
    %39 = arith.addf %34, %38 : vector<8x128xf32>
    %40 = vector.extract_strided_slice %11 {offsets = [9, 0], sizes = [1, 128], strides = [1, 1]} : vector<16x128xf32> to vector<1x128xf32>
    %41 = vector.broadcast %3 : vector<8x1xf32> to vector<8x128xf32>
    %42 = vector.broadcast %40 : vector<1x128xf32> to vector<8x128xf32>
    %43 = arith.mulf %41, %42 : vector<8x128xf32>
    %44 = arith.addf %39, %43 : vector<8x128xf32>
    %45 = vector.extract_strided_slice %11 {offsets = [13, 0], sizes = [1, 128], strides = [1, 1]} : vector<16x128xf32> to vector<1x128xf32>
    %46 = vector.broadcast %4 : vector<8x1xf32> to vector<8x128xf32>
    %47 = vector.broadcast %45 : vector<1x128xf32> to vector<8x128xf32>
    %48 = arith.mulf %46, %47 : vector<8x128xf32>
    %49 = arith.addf %44, %48 : vector<8x128xf32>
    %50 = arith.maximumf %30, %49 : vector<8x128xf32>
    %51 = vector.extract_strided_slice %11 {offsets = [2, 0], sizes = [1, 128], strides = [1, 1]} : vector<16x128xf32> to vector<1x128xf32>
    %52 = vector.broadcast %1 : vector<8x1xf32> to vector<8x128xf32>
    %53 = vector.broadcast %51 : vector<1x128xf32> to vector<8x128xf32>
    %54 = arith.mulf %52, %53 : vector<8x128xf32>
    %55 = vector.extract_strided_slice %11 {offsets = [6, 0], sizes = [1, 128], strides = [1, 1]} : vector<16x128xf32> to vector<1x128xf32>
    %56 = vector.broadcast %2 : vector<8x1xf32> to vector<8x128xf32>
    %57 = vector.broadcast %55 : vector<1x128xf32> to vector<8x128xf32>
    %58 = arith.mulf %56, %57 : vector<8x128xf32>
    %59 = arith.addf %54, %58 : vector<8x128xf32>
    %60 = vector.extract_strided_slice %11 {offsets = [10, 0], sizes = [1, 128], strides = [1, 1]} : vector<16x128xf32> to vector<1x128xf32>
    %61 = vector.broadcast %3 : vector<8x1xf32> to vector<8x128xf32>
    %62 = vector.broadcast %60 : vector<1x128xf32> to vector<8x128xf32>
    %63 = arith.mulf %61, %62 : vector<8x128xf32>
    %64 = arith.addf %59, %63 : vector<8x128xf32>
    %65 = vector.extract_strided_slice %11 {offsets = [14, 0], sizes = [1, 128], strides = [1, 1]} : vector<16x128xf32> to vector<1x128xf32>
    %66 = vector.broadcast %4 : vector<8x1xf32> to vector<8x128xf32>
    %67 = vector.broadcast %65 : vector<1x128xf32> to vector<8x128xf32>
    %68 = arith.mulf %66, %67 : vector<8x128xf32>
    %69 = arith.addf %64, %68 : vector<8x128xf32>
    %70 = arith.maximumf %50, %69 : vector<8x128xf32>
    %71 = vector.extract_strided_slice %11 {offsets = [3, 0], sizes = [1, 128], strides = [1, 1]} : vector<16x128xf32> to vector<1x128xf32>
    %72 = vector.broadcast %1 : vector<8x1xf32> to vector<8x128xf32>
    %73 = vector.broadcast %71 : vector<1x128xf32> to vector<8x128xf32>
    %74 = arith.mulf %72, %73 : vector<8x128xf32>
    %75 = vector.extract_strided_slice %11 {offsets = [7, 0], sizes = [1, 128], strides = [1, 1]} : vector<16x128xf32> to vector<1x128xf32>
    %76 = vector.broadcast %2 : vector<8x1xf32> to vector<8x128xf32>
    %77 = vector.broadcast %75 : vector<1x128xf32> to vector<8x128xf32>
    %78 = arith.mulf %76, %77 : vector<8x128xf32>
    %79 = arith.addf %74, %78 : vector<8x128xf32>
    %80 = vector.extract_strided_slice %11 {offsets = [11, 0], sizes = [1, 128], strides = [1, 1]} : vector<16x128xf32> to vector<1x128xf32>
    %81 = vector.broadcast %3 : vector<8x1xf32> to vector<8x128xf32>
    %82 = vector.broadcast %80 : vector<1x128xf32> to vector<8x128xf32>
    %83 = arith.mulf %81, %82 : vector<8x128xf32>
    %84 = arith.addf %79, %83 : vector<8x128xf32>
    %85 = vector.extract_strided_slice %11 {offsets = [15, 0], sizes = [1, 128], strides = [1, 1]} : vector<16x128xf32> to vector<1x128xf32>
    %86 = vector.broadcast %4 : vector<8x1xf32> to vector<8x128xf32>
    %87 = vector.broadcast %85 : vector<1x128xf32> to vector<8x128xf32>
    %88 = arith.mulf %86, %87 : vector<8x128xf32>
    %89 = arith.addf %84, %88 : vector<8x128xf32>
    %90 = arith.maximumf %70, %89 : vector<8x128xf32>
    %91 = arith.mulf %90, %7 : vector<8x128xf32>
    %92 = arith.addf %91, %10 : vector<8x128xf32>
    %cst = arith.constant 2.000000e-01 : f32
    %93 = vector.broadcast %cst : f32 to vector<8x128xf32>
    %94 = arith.mulf %93, %92 : vector<8x128xf32>
    %95 = arith.maximumf %92, %94 : vector<8x128xf32>
    %c0_7 = arith.constant 0 : index
    %c0_8 = arith.constant 0 : index
    %96 = vector.load %arg5[%c0_7, %c0_8] : memref<8x128xf32, #tpu.memory_space<vmem>>, vector<8x128xf32>
    tpu.vector_store %arg5[%c0_7, %c0_8], %95 {strides = array<i32>} : memref<8x128xf32, #tpu.memory_space<vmem>>, vector<8x128xf32>,
    return
  }
  func.func @transform_0(%arg0: i32) -> (i32, i32) {
    %c0_i32 = arith.constant 0 : i32
    %c0_i32_0 = arith.constant 0 : i32
    return %c0_i32, %arg0 : i32, i32
  }
  func.func @transform_1(%arg0: i32) -> (i32, i32) {
    %c0_i32 = arith.constant 0 : i32
    %c0_i32_0 = arith.constant 0 : i32
    %c0_i32_1 = arith.constant 0 : i32
    return %c0_i32, %c0_i32_0 : i32, i32
  }
  func.func @transform_2(%arg0: i32) -> (i32, i32) {
    %c0_i32 = arith.constant 0 : i32
    %c0_i32_0 = arith.constant 0 : i32
    %c0_i32_1 = arith.constant 0 : i32
    return %c0_i32, %c0_i32_0 : i32, i32
  }
  func.func @transform_3(%arg0: i32) -> (i32, i32) {
    %c0_i32 = arith.constant 0 : i32
    %c0_i32_0 = arith.constant 0 : i32
    %c0_i32_1 = arith.constant 0 : i32
    return %c0_i32, %c0_i32_0 : i32, i32
  }
  func.func @transform_4(%arg0: i32) -> (i32, i32) {
    %c0_i32 = arith.constant 0 : i32
    %c0_i32_0 = arith.constant 0 : i32
    return %c0_i32, %arg0 : i32, i32
  }
}

</mosaic_0001>

<bundles_post_ra>
// kernel: tpu_custom_call.1
= control target key start
LH: loop header
LB: loop body
LE: loop exit
PB: predicated region body
PF: predicated region fallthrough
CT: control target
= control target key end

     0   :  { %v200_v1 = vmov 0   ;;  %v201_v2 = vmov 2   ;;  %s257_s0 = inlined_call_operand.vmem [shape: f32[16,128], index: 0, kind: input, shape index: {}]   ;;  %s258_s1 = inlined_call_operand.vmem [shape: f32[8,4], index: 1, kind: input, shape index: {}]   ;;  %s259_s2 = inlined_call_operand.vmem [shape: f32[8,1], index: 2, kind: input, shape index: {}]   ;;  %s260_s3 = inlined_call_operand.vmem [shape: f32[8,1], index: 3, kind: input, shape index: {}]   ;;  %s261_s4 = inlined_call_operand.hbm [shape: f32[8,128], index: 4, kind: output, shape index: {}]  }
   0x1   :  { %v18_v0 = vld [vmem:[%s258_s1] sm:$0xff]  ;;  %169 = vset.pattern.permute.xlu0 %v200_v1  ;;  %171 = vset.pattern.permute.xlu1 %v201_v2 }
   0x2   :  { %9 = vsyncpa [#allocation3], 0  ;;  %35 = vperm.xlu0 %169, %v18_v0   ;;  %54 = vperm.xlu1 %171, %v18_v0   ;;  %v202_v3 = vmov 1   ;;  %v203_v4 = vmov 3   ;;  %v19_v5 = vld [vmem:[%s259_s2] sm:$0xff]  ;;  %v38_v7 = vlaneseq  ;;  %v32_v14 = vld [vmem:[%s257_s0 + $0x8] sm:$0xff] }
   0x3   :  { %v25_v6 = vld [vmem:[%s260_s3] sm:$0xff] }
   0x4   :  { %v39_v8 = vshrl.u32 %v38_v7, 7  ;;  %v31_v10 = vld [vmem:[%s257_s0] sm:$0xff]  ;;  %s204_s0 = smov [#allocation2]  }
   0x5   :  { %s156_s3 = sshll.u32 %s204_s0, 4  ;;  %s157_s3 = int_to_ptr.vmem [resolvable:$true] %s156_s3 }
   0x6   :  { %170 = vset.pattern.permute.xlu0 %v202_v3  ;;  %172 = vset.pattern.permute.xlu1 %v203_v4  ;;  %v40_v9 = vsub.s32 0, %v39_v8  ;;  %v75_v11 = vsub.s32 1, %v39_v8  ;;  %v99_v12 = vsub.s32 2, %v39_v8  ;;  %v123_v13 = vsub.s32 3, %v39_v8  ;;  %s176_s23 = scalar_lea.vmem %s157_s3, 128  ;;  %p181_p1 = scmp.lt.s32.totalorder %s157_s3, %s157_s3 }
   0x7   :  { %44 = vperm.xlu0 %170, %v18_v0   ;;  %64 = vperm.xlu1 %172, %v18_v0   ;;  %v49_v15 = vsub.s32 4, %v39_v8  ;;  %v80_v16 = vsub.s32 5, %v39_v8  ;;  %v104_v17 = vsub.s32 6, %v39_v8  ;;  %v128_v18 = vsub.s32 7, %v39_v8  ;;  %p177_p0 = scmp.ne.s32.totalorder %s157_s3, %s176_s23  ;;  %p182_p2 = scmp.lt.s32.totalorder %s176_s23, %s176_s23 }
   0x8   :  { %v41_v19 = vrot.slane %v31_v10, %v40_v9  ;;  %v76_v22 = vrot.slane %v31_v10, %v75_v11  ;;  %v100_v23 = vrot.slane %v31_v10, %v99_v12  ;;  %v124_v24 = vrot.slane %v31_v10, %v123_v13 }
   0x9   :  { %v60_v25 = vrot.slane %v32_v14, %v40_v9  ;;  %v50_v26 = vrot.slane %v31_v10, %v49_v15  ;;  %v81_v27 = vrot.slane %v31_v10, %v80_v16  ;;  %v105_v28 = vrot.slane %v31_v10, %v104_v17  ;;  %p183_p3 = por %p182_p2, %p181_p1 }
   0xa   :  { %v129_v29 = vrot.slane %v31_v10, %v128_v18  ;;  %v87_v30 = vrot.slane %v32_v14, %v75_v11  ;;  %v111_v31 = vrot.slane %v32_v14, %v99_v12  ;;  %v70_v32 = vrot.slane %v32_v14, %v49_v15 }
   0xb   :  { %173 = vset.pattern.permute.xlu1 %v200_v1  ;;  %174 = vset.pattern.permute.xlu0 %v200_v1  ;;  %v93_v33 = vrot.slane %v32_v14, %v80_v16  ;;  %v135_v35 = vrot.slane %v32_v14, %v123_v13  ;;  %v117_v36 = vrot.slane %v32_v14, %v104_v17  ;;  %p184_p4 = pnand %p183_p3, %p177_p0 }
   0xc   :  { %22 = vperm.xlu1 %173, %v19_v5   ;;  %28 = vperm.xlu0 %174, %v25_v6   ;;  %v141_v37 = vrot.slane %v32_v14, %v128_v18 }
  0x10   :  { %175 = vset.pattern.permute.xlu0 %v203_v4 }
  0x81   :  { %v36_v20 = vpop.permute.xlu0 %35  ;;  %v55_v21 = vpop.permute.xlu1 %54 }
  0x82   :  { %v42_v34 = vmul.f32 %v41_v19, %v36_v20  ;;  %v77_v38 = vmul.f32 %v76_v22, %v36_v20  ;;  %v101_v39 = vmul.f32 %v100_v23, %v36_v20  ;;  %v125_v40 = vmul.f32 %v124_v24, %v36_v20 }
  0x83   :  { %v61_v41 = vmul.f32 %v60_v25, %v55_v21  ;;  %v88_v48 = vmul.f32 %v87_v30, %v55_v21  ;;  %v112_v49 = vmul.f32 %v111_v31, %v55_v21  ;;  %v136_v56 = vmul.f32 %v135_v35, %v55_v21 }
  0x86   :  { %v45_v42 = vpop.permute.xlu0 %44  ;;  %v65_v43 = vpop.permute.xlu1 %64 }
  0x87   :  { %v51_v44 = vmul.f32 %v50_v26, %v45_v42  ;;  %v82_v45 = vmul.f32 %v81_v27, %v45_v42  ;;  %v106_v46 = vmul.f32 %v105_v28, %v45_v42  ;;  %v130_v47 = vmul.f32 %v129_v29, %v45_v42 }
  0x88   :  { %v71_v50 = vmul.f32 %v70_v32, %v65_v43  ;;  %v94_v51 = vmul.f32 %v93_v33, %v65_v43  ;;  %v118_v59 = vmul.f32 %v117_v36, %v65_v43  ;;  %v142_v63 = vmul.f32 %v141_v37, %v65_v43 }
  0x89   :  { %v52_v52 = vadd.f32 %v51_v44, %v42_v34  ;;  %v83_v53 = vadd.f32 %v82_v45, %v77_v38  ;;  %v107_v54 = vadd.f32 %v106_v46, %v101_v39  ;;  %v131_v55 = vadd.f32 %v130_v47, %v125_v40 }
  0x8b   :  { %v62_v57 = vadd.f32 %v61_v41, %v52_v52  ;;  %v89_v58 = vadd.f32 %v88_v48, %v83_v53  ;;  %v113_v60 = vadd.f32 %v112_v49, %v107_v54  ;;  %v137_v0 = vadd.f32 %v136_v56, %v131_v55  ;;  %v23_v5 = vpop.permute.xlu1 %22  ;;  %v29_v7 = vpop.permute.xlu0 %28 }
  0x8d   :  { %v72_v61 = vadd.f32 %v71_v50, %v62_v57  ;;  %v95_v62 = vadd.f32 %v94_v51, %v89_v58  ;;  %v119_v2 = vadd.f32 %v118_v59, %v113_v60  ;;  %v143_v4 = vadd.f32 %v142_v63, %v137_v0 }
  0x8f   :  { %v96_v1 = vmax.f32 %v72_v61, %v95_v62 }
  0x91   :  { %v120_v3 = vmax.f32 %v96_v1, %v119_v2 }
  0x93   :  { %v144_v6 = vmax.f32 %v120_v3, %v143_v4 }
  0x95   :  { %v145_v8 = vmul.f32 %v144_v6, %v23_v5 }
  0x97   :  { %v146_v9 = vadd.f32 %v145_v8, %v29_v7 }
  0x99   :  { %v147_v10 = vmul.f32 0.2, %v146_v9 }
  0x9b   :  { %v148_v11 = vmax.f32 %v146_v9, %v147_v10 }
  0x9d   :  { %149 = vst [vmem:[#allocation2] sm:$0xff] %v148_v11 }
  0x9e   :  { %187 = shalt.err (!%p184_p4)
}
  0x9f   :  { %s188_s26 = scalar_lea.hbm %s261_s4, 128 }
  0xa0   :  { %p189_p5 = scmp.ne.s32.totalorder %s261_s4, %s188_s26  ;;  %p192_p6 = scmp.lt.u32.totalorder %s188_s26, %s261_s4 }
  0xa2   :  { %p194_p7 = pnand %p192_p6, %p189_p5 }
  0xa4   :  { %197 = shalt.err (!%p194_p7)
}
  0xa5   :  { %159 = dma.vmem_to_hbm [thread:$0]  %s157_s3, 128, %s261_s4, [#allocation3]  }
  0xa6   :  { %198 = dma.done.wait [#allocation3], 128  }
  0xa7   :  { %199 = vsyncadd [#allocation3], 4294967168 }
  0xa8   :  { %163 = vsyncpa [#allocation3], 1 }

</bundles_post_ra>
